<compile_context>
chip_gen: v5e
topology: v5e:2x2
jax: 0.10.0
libtpu: 0.0.40
codegen_flags: <defaults>
</compile_context>

<pallas_src>
import functools

import jax
import jax.numpy as jnp
from jax.experimental import pallas as pl
from jax.experimental.pallas import tpu as pltpu

# (in_features, out_features) of every Linear, in forward order.
_LAYER_DIMS = [
    (256, 192), (192, 64), (64, 36), (36, 18), (18, 9),      # encode
    (9, 18), (18, 36), (36, 64), (64, 128), (128, 256),      # decode
]
_N_LAYERS = len(_LAYER_DIMS)
_LANE = 128


def _round_up(x, m):
    return ((x + m - 1) // m) * m


# Lane-padded layer dims (zero-padded; results identical, all tiles lane-dense).
_PADDED_DIMS = [(_round_up(fi, _LANE), _round_up(fo, _LANE)) for fi, fo in _LAYER_DIMS]


def _ae_kernel(x_ref, *refs):
    # refs = (w1, b1, w2, b2, ..., w10, b10, o_ref)
    o_ref = refs[-1]
    param_refs = refs[:-1]

    h = x_ref[...].astype(jnp.float32)

    for layer in range(_N_LAYERS):
        w = param_refs[2 * layer][...]                           # (in_p, out_p)
        b = param_refs[2 * layer + 1][...].astype(jnp.float32)   # (1, out_p)

        # Decoder layers (layer >= 5) have a ReLU *before* the Linear;
        # encoder layers 0..3 have a ReLU *after* (handled below).
        if layer >= 5:
            h = jnp.maximum(h, 0.0)

        # h is cast to the weight dtype (no-op for f32; bf16 on the optional
        # bf16-weight path); accumulation stays in f32 on the MXU.
        h = jnp.dot(h.astype(w.dtype), w, preferred_element_type=jnp.float32) + b

        if layer < 4:  # encoder ReLUs (none after the bottleneck Linear)
            h = jnp.maximum(h, 0.0)

    # Final Sigmoid of the decoder (output width is exactly 256, no padding).
    o_ref[...] = jax.nn.sigmoid(h).astype(o_ref.dtype)


@functools.partial(jax.jit, static_argnames=("block_b", "weights_bf16"))
def ae_forward(x, params, block_b=512, weights_bf16=False):
    """x: (B, 256) float32.  params: flat list [w1, b1, ..., w10, b10] with
    w_i of shape (in, out) and b_i of shape (out,) or (1, out)."""
    B, D_in = x.shape
    assert D_in == 256, D_in

    # ---- Lane-pad weights/biases (wrapper-side, zero padding => exact). ----
    w_dtype = jnp.bfloat16 if weights_bf16 else jnp.float32
    padded_params = []
    for idx, (fin, fout) in enumerate(_LAYER_DIMS):
        fin_p, fout_p = _PADDED_DIMS[idx]
        w = params[2 * idx].astype(jnp.float32)
        b = params[2 * idx + 1].astype(jnp.float32).reshape(1, fout)
        w = jnp.pad(w, ((0, fin_p - fin), (0, fout_p - fout))).astype(w_dtype)
        b = jnp.pad(b, ((0, 0), (0, fout_p - fout)))
        padded_params += [w, b]

    # ---- Batch tiling. ----
    # Pad only to a multiple of 8 sublanes when strictly required; the
    # block-size remainder is handled by Pallas partial-block masking
    # (rows are independent, so garbage rows never contaminate valid output).
    B8 = _round_up(B, 8)
    if B8 != B:
        x = jnp.pad(x, ((0, B8 - B), (0, 0)))

    bb = max(8, min(_round_up(block_b, 8), B8))
    # Keep >= 2 grid steps when possible so megacore can use both TensorCores.
    if B8 > 8 and pl.cdiv(B8, bb) < 2:
        bb = _round_up(pl.cdiv(B8, 2), 8)
    grid = (pl.cdiv(B8, bb),)

    in_specs = [pl.BlockSpec((bb, 256), lambda i: (i, 0))]
    for fin_p, fout_p in _PADDED_DIMS:
        in_specs.append(pl.BlockSpec((fin_p, fout_p), lambda i: (0, 0)))  # weight
        in_specs.append(pl.BlockSpec((1, fout_p), lambda i: (0, 0)))      # bias
    out_spec = pl.BlockSpec((bb, 256), lambda i: (i, 0))

    # ---- Scheduling hints. ----
    flops = 2 * B8 * sum(fi * fo for fi, fo in _PADDED_DIMS)
    transcendentals = B8 * 256  # sigmoid
    param_bytes = 4 * sum(fi * fo + fo for fi, fo in _PADDED_DIMS)
    bytes_accessed = 4 * (2 * B8 * 256) + param_bytes

    out = pl.pallas_call(
        _ae_kernel,
        out_shape=jax.ShapeDtypeStruct((B8, 256), x.dtype),
        grid_spec=pltpu.PrefetchScalarGridSpec(
            num_scalar_prefetch=0,
            grid=grid,
            in_specs=in_specs,
            out_specs=out_spec,
        ),
        compiler_params=pltpu.CompilerParams(
            dimension_semantics=("parallel",),
            vmem_limit_bytes=32 * 1024 * 1024,
        ),
        cost_estimate=pl.CostEstimate(
            flops=flops,
            transcendentals=transcendentals,
            bytes_accessed=bytes_accessed,
        ),
    )(x, *padded_params)

    return out[:B]


def init_params(key):
    """Deterministic Kaiming-uniform-ish init matching nn.Linear shapes."""
    params = []
    for fin, fout in _LAYER_DIMS:
        key, kw, kb = jax.random.split(key, 3)
        bound = 1.0 / jnp.sqrt(float(fin))
        params.append(jax.random.uniform(kw, (fin, fout), jnp.float32, -bound, bound))
        params.append(jax.random.uniform(kb, (fout,), jnp.float32, -bound, bound))
    return params


def _reference_forward(x, params):
    """Pure-JAX reference of the same forward pass (for a sanity check)."""
    h = x
    for layer in range(_N_LAYERS):
        w = params[2 * layer]
        b = params[2 * layer + 1].reshape(1, -1)
        if layer >= 5:
            h = jnp.maximum(h, 0.0)
        h = h @ w + b
        if layer < 4:
            h = jnp.maximum(h, 0.0)
    return jax.nn.sigmoid(h)


if __name__ == "__main__":
    key = jax.random.PRNGKey(0)
    kx, kp = jax.random.split(key)
    params = init_params(kp)

    # Small-shape check (batch=2; the module's input is 16*16 = 256 features).
    x_small = jax.random.normal(kx, (2, 16 * 16), jnp.float32)
    out_small = jax.block_until_ready(ae_forward(x_small, params))
    ref_small = _reference_forward(x_small, params)
    assert out_small.shape == (2, 256), out_small.shape
    assert jnp.allclose(out_small, ref_small, atol=1e-5, rtol=1e-5), (
        float(jnp.max(jnp.abs(out_small - ref_small)))
    )

    # Also exercise the large-tile + partial-final-block path (520 = 512 + 8).
    x_big = jax.random.normal(kx, (520, 16 * 16), jnp.float32)
    out_big = jax.block_until_ready(ae_forward(x_big, params))
    ref_big = _reference_forward(x_big, params)
    assert out_big.shape == (520, 256), out_big.shape
    assert jnp.allclose(out_big, ref_big, atol=1e-5, rtol=1e-5), (
        float(jnp.max(jnp.abs(out_big - ref_big)))
    )

    print("KERNEL_OK")
</pallas_src>

<mosaic_0001>
module attributes {stable_mosaic.version = 11 : i64} {
  func.func @_ae_kernel(%arg0: i32, %arg1: memref<8x256xf32, #tpu.memory_space<vmem>>, %arg2: memref<256x256xf32, #tpu.memory_space<vmem>>, %arg3: memref<1x256xf32, #tpu.memory_space<vmem>>, %arg4: memref<256x128xf32, #tpu.memory_space<vmem>>, %arg5: memref<1x128xf32, #tpu.memory_space<vmem>>, %arg6: memref<128x128xf32, #tpu.memory_space<vmem>>, %arg7: memref<1x128xf32, #tpu.memory_space<vmem>>, %arg8: memref<128x128xf32, #tpu.memory_space<vmem>>, %arg9: memref<1x128xf32, #tpu.memory_space<vmem>>, %arg10: memref<128x128xf32, #tpu.memory_space<vmem>>, %arg11: memref<1x128xf32, #tpu.memory_space<vmem>>, %arg12: memref<128x128xf32, #tpu.memory_space<vmem>>, %arg13: memref<1x128xf32, #tpu.memory_space<vmem>>, %arg14: memref<128x128xf32, #tpu.memory_space<vmem>>, %arg15: memref<1x128xf32, #tpu.memory_space<vmem>>, %arg16: memref<128x128xf32, #tpu.memory_space<vmem>>, %arg17: memref<1x128xf32, #tpu.memory_space<vmem>>, %arg18: memref<128x128xf32, #tpu.memory_space<vmem>>, %arg19: memref<1x128xf32, #tpu.memory_space<vmem>>, %arg20: memref<128x256xf32, #tpu.memory_space<vmem>>, %arg21: memref<1x256xf32, #tpu.memory_space<vmem>>, %arg22: memref<8x256xf32, #tpu.memory_space<vmem>>) attributes {dimension_semantics = [#tpu.dimension_semantics<parallel>], iteration_bounds = array<i64: 1>, scalar_prefetch = 0 : i64, scratch_operands = 0 : i64, tpu.core_type = #tpu.core_type<tc>, window_params = [{transform_indices = @transform_0, window_bounds = array<i64: 8, 256>}, {pipeline_mode = #tpu.pipeline_mode<synchronous>, transform_indices = @transform_1, window_bounds = array<i64: 256, 256>}, {pipeline_mode = #tpu.pipeline_mode<synchronous>, transform_indices = @transform_2, window_bounds = array<i64: 1, 256>}, {pipeline_mode = #tpu.pipeline_mode<synchronous>, transform_indices = @transform_3, window_bounds = array<i64: 256, 128>}, {pipeline_mode = #tpu.pipeline_mode<synchronous>, transform_indices = @transform_4, window_bounds = array<i64: 1, 128>}, {pipeline_mode = #tpu.pipeline_mode<synchronous>, transform_indices = @transform_5, window_bounds = array<i64: 128, 128>}, {pipeline_mode = #tpu.pipeline_mode<synchronous>, transform_indices = @transform_6, window_bounds = array<i64: 1, 128>}, {pipeline_mode = #tpu.pipeline_mode<synchronous>, transform_indices = @transform_7, window_bounds = array<i64: 128, 128>}, {pipeline_mode = #tpu.pipeline_mode<synchronous>, transform_indices = @transform_8, window_bounds = array<i64: 1, 128>}, {pipeline_mode = #tpu.pipeline_mode<synchronous>, transform_indices = @transform_9, window_bounds = array<i64: 128, 128>}, {pipeline_mode = #tpu.pipeline_mode<synchronous>, transform_indices = @transform_10, window_bounds = array<i64: 1, 128>}, {pipeline_mode = #tpu.pipeline_mode<synchronous>, transform_indices = @transform_11, window_bounds = array<i64: 128, 128>}, {pipeline_mode = #tpu.pipeline_mode<synchronous>, transform_indices = @transform_12, window_bounds = array<i64: 1, 128>}, {pipeline_mode = #tpu.pipeline_mode<synchronous>, transform_indices = @transform_13, window_bounds = array<i64: 128, 128>}, {pipeline_mode = #tpu.pipeline_mode<synchronous>, transform_indices = @transform_14, window_bounds = array<i64: 1, 128>}, {pipeline_mode = #tpu.pipeline_mode<synchronous>, transform_indices = @transform_15, window_bounds = array<i64: 128, 128>}, {pipeline_mode = #tpu.pipeline_mode<synchronous>, transform_indices = @transform_16, window_bounds = array<i64: 1, 128>}, {pipeline_mode = #tpu.pipeline_mode<synchronous>, transform_indices = @transform_17, window_bounds = array<i64: 128, 128>}, {pipeline_mode = #tpu.pipeline_mode<synchronous>, transform_indices = @transform_18, window_bounds = array<i64: 1, 128>}, {pipeline_mode = #tpu.pipeline_mode<synchronous>, transform_indices = @transform_19, window_bounds = array<i64: 128, 256>}, {pipeline_mode = #tpu.pipeline_mode<synchronous>, transform_indices = @transform_20, window_bounds = array<i64: 1, 256>}, {transform_indices = @transform_21, window_bounds = array<i64: 8, 256>}]} {
    %c0 = arith.constant 0 : index
    %c0_0 = arith.constant 0 : index
    %0 = vector.load %arg1[%c0, %c0_0] : memref<8x256xf32, #tpu.memory_space<vmem>>, vector<8x256xf32>
    %c0_1 = arith.constant 0 : index
    %c0_2 = arith.constant 0 : index
    %1 = vector.load %arg2[%c0_1, %c0_2] : memref<256x256xf32, #tpu.memory_space<vmem>>, vector<256x256xf32>
    %c0_3 = arith.constant 0 : index
    %c0_4 = arith.constant 0 : index
    %2 = vector.load %arg3[%c0_3, %c0_4] : memref<1x256xf32, #tpu.memory_space<vmem>>, vector<1x256xf32>
    %cst = arith.constant dense<0.000000e+00> : vector<8x256xf32>
    %3 = tpu.matmul %0, %1, %cst {dimension_numbers = #tpu.dot_dimension_numbers<[1], [0], [0], [1], [0, 0, 1, 1], [], []>} : vector<8x256xf32>, vector<256x256xf32>, vector<8x256xf32> -> vector<8x256xf32>
    %4 = vector.broadcast %2 : vector<1x256xf32> to vector<8x256xf32>
    %5 = arith.addf %3, %4 : vector<8x256xf32>
    %cst_5 = arith.constant 0.000000e+00 : f32
    %6 = vector.broadcast %cst_5 : f32 to vector<8x256xf32>
    %7 = arith.maximumf %5, %6 : vector<8x256xf32>
    %c0_6 = arith.constant 0 : index
    %c0_7 = arith.constant 0 : index
    %8 = vector.load %arg4[%c0_6, %c0_7] : memref<256x128xf32, #tpu.memory_space<vmem>>, vector<256x128xf32>
    %c0_8 = arith.constant 0 : index
    %c0_9 = arith.constant 0 : index
    %9 = vector.load %arg5[%c0_8, %c0_9] : memref<1x128xf32, #tpu.memory_space<vmem>>, vector<1x128xf32>
    %cst_10 = arith.constant dense<0.000000e+00> : vector<8x128xf32>
    %10 = tpu.matmul %7, %8, %cst_10 {dimension_numbers = #tpu.dot_dimension_numbers<[1], [0], [0], [1], [0, 0, 1, 1], [], []>} : vector<8x256xf32>, vector<256x128xf32>, vector<8x128xf32> -> vector<8x128xf32>
    %11 = vector.broadcast %9 : vector<1x128xf32> to vector<8x128xf32>
    %12 = arith.addf %10, %11 : vector<8x128xf32>
    %cst_11 = arith.constant 0.000000e+00 : f32
    %13 = vector.broadcast %cst_11 : f32 to vector<8x128xf32>
    %14 = arith.maximumf %12, %13 : vector<8x128xf32>
    %c0_12 = arith.constant 0 : index
    %c0_13 = arith.constant 0 : index
    %15 = vector.load %arg6[%c0_12, %c0_13] : memref<128x128xf32, #tpu.memory_space<vmem>>, vector<128x128xf32>
    %c0_14 = arith.constant 0 : index
    %c0_15 = arith.constant 0 : index
    %16 = vector.load %arg7[%c0_14, %c0_15] : memref<1x128xf32, #tpu.memory_space<vmem>>, vector<1x128xf32>
    %cst_16 = arith.constant dense<0.000000e+00> : vector<8x128xf32>
    %17 = tpu.matmul %14, %15, %cst_16 {dimension_numbers = #tpu.dot_dimension_numbers<[1], [0], [0], [1], [0, 0, 1, 1], [], []>} : vector<8x128xf32>, vector<128x128xf32>, vector<8x128xf32> -> vector<8x128xf32>
    %18 = vector.broadcast %16 : vector<1x128xf32> to vector<8x128xf32>
    %19 = arith.addf %17, %18 : vector<8x128xf32>
    %cst_17 = arith.constant 0.000000e+00 : f32
    %20 = vector.broadcast %cst_17 : f32 to vector<8x128xf32>
    %21 = arith.maximumf %19, %20 : vector<8x128xf32>
    %c0_18 = arith.constant 0 : index
    %c0_19 = arith.constant 0 : index
    %22 = vector.load %arg8[%c0_18, %c0_19] : memref<128x128xf32, #tpu.memory_space<vmem>>, vector<128x128xf32>
    %c0_20 = arith.constant 0 : index
    %c0_21 = arith.constant 0 : index
    %23 = vector.load %arg9[%c0_20, %c0_21] : memref<1x128xf32, #tpu.memory_space<vmem>>, vector<1x128xf32>
    %cst_22 = arith.constant dense<0.000000e+00> : vector<8x128xf32>
    %24 = tpu.matmul %21, %22, %cst_22 {dimension_numbers = #tpu.dot_dimension_numbers<[1], [0], [0], [1], [0, 0, 1, 1], [], []>} : vector<8x128xf32>, vector<128x128xf32>, vector<8x128xf32> -> vector<8x128xf32>
    %25 = vector.broadcast %23 : vector<1x128xf32> to vector<8x128xf32>
    %26 = arith.addf %24, %25 : vector<8x128xf32>
    %cst_23 = arith.constant 0.000000e+00 : f32
    %27 = vector.broadcast %cst_23 : f32 to vector<8x128xf32>
    %28 = arith.maximumf %26, %27 : vector<8x128xf32>
    %c0_24 = arith.constant 0 : index
    %c0_25 = arith.constant 0 : index
    %29 = vector.load %arg10[%c0_24, %c0_25] : memref<128x128xf32, #tpu.memory_space<vmem>>, vector<128x128xf32>
    %c0_26 = arith.constant 0 : index
    %c0_27 = arith.constant 0 : index
    %30 = vector.load %arg11[%c0_26, %c0_27] : memref<1x128xf32, #tpu.memory_space<vmem>>, vector<1x128xf32>
    %cst_28 = arith.constant dense<0.000000e+00> : vector<8x128xf32>
    %31 = tpu.matmul %28, %29, %cst_28 {dimension_numbers = #tpu.dot_dimension_numbers<[1], [0], [0], [1], [0, 0, 1, 1], [], []>} : vector<8x128xf32>, vector<128x128xf32>, vector<8x128xf32> -> vector<8x128xf32>
    %32 = vector.broadcast %30 : vector<1x128xf32> to vector<8x128xf32>
    %33 = arith.addf %31, %32 : vector<8x128xf32>
    %c0_29 = arith.constant 0 : index
    %c0_30 = arith.constant 0 : index
    %34 = vector.load %arg12[%c0_29, %c0_30] : memref<128x128xf32, #tpu.memory_space<vmem>>, vector<128x128xf32>
    %c0_31 = arith.constant 0 : index
    %c0_32 = arith.constant 0 : index
    %35 = vector.load %arg13[%c0_31, %c0_32] : memref<1x128xf32, #tpu.memory_space<vmem>>, vector<1x128xf32>
    %cst_33 = arith.constant 0.000000e+00 : f32
    %36 = vector.broadcast %cst_33 : f32 to vector<8x128xf32>
    %37 = arith.maximumf %33, %36 : vector<8x128xf32>
    %cst_34 = arith.constant dense<0.000000e+00> : vector<8x128xf32>
    %38 = tpu.matmul %37, %34, %cst_34 {dimension_numbers = #tpu.dot_dimension_numbers<[1], [0], [0], [1], [0, 0, 1, 1], [], []>} : vector<8x128xf32>, vector<128x128xf32>, vector<8x128xf32> -> vector<8x128xf32>
    %39 = vector.broadcast %35 : vector<1x128xf32> to vector<8x128xf32>
    %40 = arith.addf %38, %39 : vector<8x128xf32>
    %c0_35 = arith.constant 0 : index
    %c0_36 = arith.constant 0 : index
    %41 = vector.load %arg14[%c0_35, %c0_36] : memref<128x128xf32, #tpu.memory_space<vmem>>, vector<128x128xf32>
    %c0_37 = arith.constant 0 : index
    %c0_38 = arith.constant 0 : index
    %42 = vector.load %arg15[%c0_37, %c0_38] : memref<1x128xf32, #tpu.memory_space<vmem>>, vector<1x128xf32>
    %cst_39 = arith.constant 0.000000e+00 : f32
    %43 = vector.broadcast %cst_39 : f32 to vector<8x128xf32>
    %44 = arith.maximumf %40, %43 : vector<8x128xf32>
    %cst_40 = arith.constant dense<0.000000e+00> : vector<8x128xf32>
    %45 = tpu.matmul %44, %41, %cst_40 {dimension_numbers = #tpu.dot_dimension_numbers<[1], [0], [0], [1], [0, 0, 1, 1], [], []>} : vector<8x128xf32>, vector<128x128xf32>, vector<8x128xf32> -> vector<8x128xf32>
    %46 = vector.broadcast %42 : vector<1x128xf32> to vector<8x128xf32>
    %47 = arith.addf %45, %46 : vector<8x128xf32>
    %c0_41 = arith.constant 0 : index
    %c0_42 = arith.constant 0 : index
    %48 = vector.load %arg16[%c0_41, %c0_42] : memref<128x128xf32, #tpu.memory_space<vmem>>, vector<128x128xf32>
    %c0_43 = arith.constant 0 : index
    %c0_44 = arith.constant 0 : index
    %49 = vector.load %arg17[%c0_43, %c0_44] : memref<1x128xf32, #tpu.memory_space<vmem>>, vector<1x128xf32>
    %cst_45 = arith.constant 0.000000e+00 : f32
    %50 = vector.broadcast %cst_45 : f32 to vector<8x128xf32>
    %51 = arith.maximumf %47, %50 : vector<8x128xf32>
    %cst_46 = arith.constant dense<0.000000e+00> : vector<8x128xf32>
    %52 = tpu.matmul %51, %48, %cst_46 {dimension_numbers = #tpu.dot_dimension_numbers<[1], [0], [0], [1], [0, 0, 1, 1], [], []>} : vector<8x128xf32>, vector<128x128xf32>, vector<8x128xf32> -> vector<8x128xf32>
    %53 = vector.broadcast %49 : vector<1x128xf32> to vector<8x128xf32>
    %54 = arith.addf %52, %53 : vector<8x128xf32>
    %c0_47 = arith.constant 0 : index
    %c0_48 = arith.constant 0 : index
    %55 = vector.load %arg18[%c0_47, %c0_48] : memref<128x128xf32, #tpu.memory_space<vmem>>, vector<128x128xf32>
    %c0_49 = arith.constant 0 : index
    %c0_50 = arith.constant 0 : index
    %56 = vector.load %arg19[%c0_49, %c0_50] : memref<1x128xf32, #tpu.memory_space<vmem>>, vector<1x128xf32>
    %cst_51 = arith.constant 0.000000e+00 : f32
    %57 = vector.broadcast %cst_51 : f32 to vector<8x128xf32>
    %58 = arith.maximumf %54, %57 : vector<8x128xf32>
    %cst_52 = arith.constant dense<0.000000e+00> : vector<8x128xf32>
    %59 = tpu.matmul %58, %55, %cst_52 {dimension_numbers = #tpu.dot_dimension_numbers<[1], [0], [0], [1], [0, 0, 1, 1], [], []>} : vector<8x128xf32>, vector<128x128xf32>, vector<8x128xf32> -> vector<8x128xf32>
    %60 = vector.broadcast %56 : vector<1x128xf32> to vector<8x128xf32>
    %61 = arith.addf %59, %60 : vector<8x128xf32>
    %c0_53 = arith.constant 0 : index
    %c0_54 = arith.constant 0 : index
    %62 = vector.load %arg20[%c0_53, %c0_54] : memref<128x256xf32, #tpu.memory_space<vmem>>, vector<128x256xf32>
    %c0_55 = arith.constant 0 : index
    %c0_56 = arith.constant 0 : index
    %63 = vector.load %arg21[%c0_55, %c0_56] : memref<1x256xf32, #tpu.memory_space<vmem>>, vector<1x256xf32>
    %cst_57 = arith.constant 0.000000e+00 : f32
    %64 = vector.broadcast %cst_57 : f32 to vector<8x128xf32>
    %65 = arith.maximumf %61, %64 : vector<8x128xf32>
    %cst_58 = arith.constant dense<0.000000e+00> : vector<8x256xf32>
    %66 = tpu.matmul %65, %62, %cst_58 {dimension_numbers = #tpu.dot_dimension_numbers<[1], [0], [0], [1], [0, 0, 1, 1], [], []>} : vector<8x128xf32>, vector<128x256xf32>, vector<8x256xf32> -> vector<8x256xf32>
    %67 = vector.broadcast %63 : vector<1x256xf32> to vector<8x256xf32>
    %68 = arith.addf %66, %67 : vector<8x256xf32>
    %69 = arith.negf %68 : vector<8x256xf32>
    %70 = math.exp %69 : vector<8x256xf32>
    %cst_59 = arith.constant 1.000000e+00 : f32
    %71 = vector.broadcast %cst_59 : f32 to vector<8x256xf32>
    %72 = arith.addf %71, %70 : vector<8x256xf32>
    %73 = arith.divf %71, %72 : vector<8x256xf32>
    %c0_60 = arith.constant 0 : index
    %c0_61 = arith.constant 0 : index
    %74 = vector.load %arg22[%c0_60, %c0_61] : memref<8x256xf32, #tpu.memory_space<vmem>>, vector<8x256xf32>
    tpu.vector_store %arg22[%c0_60, %c0_61], %73 {strides = array<i32>} : memref<8x256xf32, #tpu.memory_space<vmem>>, vector<8x256xf32>,
    return
  }
  func.func @transform_0(%arg0: i32) -> (i32, i32) {
    %c0_i32 = arith.constant 0 : i32
    %c0_i32_0 = arith.constant 0 : i32
    return %arg0, %c0_i32 : i32, i32
  }
  func.func @transform_1(%arg0: i32) -> (i32, i32) {
    %c0_i32 = arith.constant 0 : i32
    %c0_i32_0 = arith.constant 0 : i32
    %c0_i32_1 = arith.constant 0 : i32
    return %c0_i32, %c0_i32_0 : i32, i32
  }
  func.func @transform_2(%arg0: i32) -> (i32, i32) {
    %c0_i32 = arith.constant 0 : i32
    %c0_i32_0 = arith.constant 0 : i32
    %c0_i32_1 = arith.constant 0 : i32
    return %c0_i32, %c0_i32_0 : i32, i32
  }
  func.func @transform_3(%arg0: i32) -> (i32, i32) {
    %c0_i32 = arith.constant 0 : i32
    %c0_i32_0 = arith.constant 0 : i32
    %c0_i32_1 = arith.constant 0 : i32
    return %c0_i32, %c0_i32_0 : i32, i32
  }
  func.func @transform_4(%arg0: i32) -> (i32, i32) {
    %c0_i32 = arith.constant 0 : i32
    %c0_i32_0 = arith.constant 0 : i32
    %c0_i32_1 = arith.constant 0 : i32
    return %c0_i32, %c0_i32_0 : i32, i32
  }
  func.func @transform_5(%arg0: i32) -> (i32, i32) {
    %c0_i32 = arith.constant 0 : i32
    %c0_i32_0 = arith.constant 0 : i32
    %c0_i32_1 = arith.constant 0 : i32
    return %c0_i32, %c0_i32_0 : i32, i32
  }
  func.func @transform_6(%arg0: i32) -> (i32, i32) {
    %c0_i32 = arith.constant 0 : i32
    %c0_i32_0 = arith.constant 0 : i32
    %c0_i32_1 = arith.constant 0 : i32
    return %c0_i32, %c0_i32_0 : i32, i32
  }
  func.func @transform_7(%arg0: i32) -> (i32, i32) {
    %c0_i32 = arith.constant 0 : i32
    %c0_i32_0 = arith.constant 0 : i32
    %c0_i32_1 = arith.constant 0 : i32
    return %c0_i32, %c0_i32_0 : i32, i32
  }
  func.func @transform_8(%arg0: i32) -> (i32, i32) {
    %c0_i32 = arith.constant 0 : i32
    %c0_i32_0 = arith.constant 0 : i32
    %c0_i32_1 = arith.constant 0 : i32
    return %c0_i32, %c0_i32_0 : i32, i32
  }
  func.func @transform_9(%arg0: i32) -> (i32, i32) {
    %c0_i32 = arith.constant 0 : i32
    %c0_i32_0 = arith.constant 0 : i32
    %c0_i32_1 = arith.constant 0 : i32
    return %c0_i32, %c0_i32_0 : i32, i32
  }
  func.func @transform_10(%arg0: i32) -> (i32, i32) {
    %c0_i32 = arith.constant 0 : i32
    %c0_i32_0 = arith.constant 0 : i32
    %c0_i32_1 = arith.constant 0 : i32
    return %c0_i32, %c0_i32_0 : i32, i32
  }
  func.func @transform_11(%arg0: i32) -> (i32, i32) {
    %c0_i32 = arith.constant 0 : i32
    %c0_i32_0 = arith.constant 0 : i32
    %c0_i32_1 = arith.constant 0 : i32
    return %c0_i32, %c0_i32_0 : i32, i32
  }
  func.func @transform_12(%arg0: i32) -> (i32, i32) {
    %c0_i32 = arith.constant 0 : i32
    %c0_i32_0 = arith.constant 0 : i32
    %c0_i32_1 = arith.constant 0 : i32
    return %c0_i32, %c0_i32_0 : i32, i32
  }
  func.func @transform_13(%arg0: i32) -> (i32, i32) {
    %c0_i32 = arith.constant 0 : i32
    %c0_i32_0 = arith.constant 0 : i32
    %c0_i32_1 = arith.constant 0 : i32
    return %c0_i32, %c0_i32_0 : i32, i32
  }
  func.func @transform_14(%arg0: i32) -> (i32, i32) {
    %c0_i32 = arith.constant 0 : i32
    %c0_i32_0 = arith.constant 0 : i32
    %c0_i32_1 = arith.constant 0 : i32
    return %c0_i32, %c0_i32_0 : i32, i32
  }
  func.func @transform_15(%arg0: i32) -> (i32, i32) {
    %c0_i32 = arith.constant 0 : i32
    %c0_i32_0 = arith.constant 0 : i32
    %c0_i32_1 = arith.constant 0 : i32
    return %c0_i32, %c0_i32_0 : i32, i32
  }
  func.func @transform_16(%arg0: i32) -> (i32, i32) {
    %c0_i32 = arith.constant 0 : i32
    %c0_i32_0 = arith.constant 0 : i32
    %c0_i32_1 = arith.constant 0 : i32
    return %c0_i32, %c0_i32_0 : i32, i32
  }
  func.func @transform_17(%arg0: i32) -> (i32, i32) {
    %c0_i32 = arith.constant 0 : i32
    %c0_i32_0 = arith.constant 0 : i32
    %c0_i32_1 = arith.constant 0 : i32
    return %c0_i32, %c0_i32_0 : i32, i32
  }
  func.func @transform_18(%arg0: i32) -> (i32, i32) {
    %c0_i32 = arith.constant 0 : i32
    %c0_i32_0 = arith.constant 0 : i32
    %c0_i32_1 = arith.constant 0 : i32
    return %c0_i32, %c0_i32_0 : i32, i32
  }
  func.func @transform_19(%arg0: i32) -> (i32, i32) {
    %c0_i32 = arith.constant 0 : i32
    %c0_i32_0 = arith.constant 0 : i32
    %c0_i32_1 = arith.constant 0 : i32
    return %c0_i32, %c0_i32_0 : i32, i32
  }
  func.func @transform_20(%arg0: i32) -> (i32, i32) {
    %c0_i32 = arith.constant 0 : i32
    %c0_i32_0 = arith.constant 0 : i32
    %c0_i32_1 = arith.constant 0 : i32
    return %c0_i32, %c0_i32_0 : i32, i32
  }
  func.func @transform_21(%arg0: i32) -> (i32, i32) {
    %c0_i32 = arith.constant 0 : i32
    %c0_i32_0 = arith.constant 0 : i32
    return %arg0, %c0_i32 : i32, i32
  }
}

</mosaic_0001>

<bundles_post_ra>
// kernel: ae_forward.1
= control target key start
LH: loop header
LB: loop body
LE: loop exit
PB: predicated region body
PF: predicated region fallthrough
CT: control target
= control target key end

     0   :  { %s1598_s1 = inlined_call_operand.vmem [shape: f32[256,256], index: 1, kind: input, shape index: {}]   ;;  %s1599_s0 = inlined_call_operand.vmem [shape: f32[8,256], index: 0, kind: input, shape index: {}]   ;;  %s1600_s3 = inlined_call_operand.vmem [shape: f32[256,128], index: 3, kind: input, shape index: {}]   ;;  %s1601_s4 = inlined_call_operand.vmem [shape: f32[1,128], index: 4, kind: input, shape index: {}]   ;;  %s1602_s5 = inlined_call_operand.vmem [shape: f32[128,128], index: 5, kind: input, shape index: {}]   ;;  %s1603_s2 = inlined_call_operand.vmem [shape: f32[1,256], index: 2, kind: input, shape index: {}]   ;;  %s1604_s6 = inlined_call_operand.vmem [shape: f32[1,128], index: 6, kind: input, shape index: {}]   ;;  %s1605_s7 = inlined_call_operand.vmem [shape: f32[128,128], index: 7, kind: input, shape index: {}]   ;;  %s1606_s8 = inlined_call_operand.vmem [shape: f32[1,128], index: 8, kind: input, shape index: {}]   ;;  %s1607_s9 = inlined_call_operand.vmem [shape: f32[128,128], index: 9, kind: input, shape index: {}]   ;;  %s1608_s10 = inlined_call_operand.vmem [shape: f32[1,128], index: 10, kind: input, shape index: {}]   ;;  %s1609_s11 = inlined_call_operand.vmem [shape: f32[128,128], index: 11, kind: input, shape index: {}]   ;;  %s1610_s12 = inlined_call_operand.vmem [shape: f32[1,128], index: 12, kind: input, shape index: {}]   ;;  %s1611_s13 = inlined_call_operand.vmem [shape: f32[128,128], index: 13, kind: input, shape index: {}]   ;;  %s1612_s14 = inlined_call_operand.vmem [shape: f32[1,128], index: 14, kind: input, shape index: {}]   ;;  %s1613_s15 = inlined_call_operand.vmem [shape: f32[128,128], index: 15, kind: input, shape index: {}]   ;;  %s1614_s16 = inlined_call_operand.vmem [shape: f32[1,128], index: 16, kind: input, shape index: {}]   ;;  %s1615_s17 = inlined_call_operand.vmem [shape: f32[128,128], index: 17, kind: input, shape index: {}]   ;;  %s1616_s18 = inlined_call_operand.vmem [shape: f32[1,128], index: 18, kind: input, shape index: {}]   ;;  %s1617_s19 = inlined_call_operand.vmem [shape: f32[128,256], index: 19, kind: input, shape index: {}]   ;;  %s1618_s20 = inlined_call_operand.vmem [shape: f32[1,256], index: 20, kind: input, shape index: {}]   ;;  %s1619_s21 = inlined_call_operand.vmem [shape: f32[8,256], index: 21, kind: output, shape index: {}]  }
   0x1   :  { %1624 = sst [smem:[#allocation2_spill]] %s1598_s1 }
   0x2   :  { %1625 = sst [smem:[#allocation3_spill]] %s1599_s0 }
   0x3   :  { %1626 = sst [smem:[#allocation4_spill]] %s1600_s3 }
   0x4   :  { %1627 = sst [smem:[#allocation5_spill]] %s1601_s4 }
   0x5   :  { %1628 = sst [smem:[#allocation6_spill]] %s1602_s5 }
   0x6   :  { %1629 = sst [smem:[#allocation7_spill]] %s1603_s2 }
   0x7   :  { %s1630_s26 = sld [smem:[#allocation2_spill]] }
   0x8   :  { %s1631_s0 = sld [smem:[#allocation3_spill]] }
   0x9   :  { %s1632_s2 = sld [smem:[#allocation4_spill]] }
   0xa   :  { %s1633_s4 = sld [smem:[#allocation6_spill]] }
   0xb   :  { %s1634_s30 = sld [smem:[#allocation7_spill]] }
   0xc   :  { %s1635_s27 = sld [smem:[#allocation5_spill]] }
   0xd   :  { %v101_v0 = vld [vmem:[%s1630_s26 + $0xf8] sm:$0xff]  ;;  %v99_v1 = vld [vmem:[%s1630_s26 + $0xe8] sm:$0xff]  ;;  %v100_v3 = vld [vmem:[%s1630_s26 + $0xf0] sm:$0xff] }
   0xe   :  { %v133_v2 = vld [vmem:[%s1630_s26 + $0x1f8] sm:$0xff]  ;;  %180 = vmatpush.msra.mxu2 %v101_v0  ;;  %v131_v4 = vld [vmem:[%s1630_s26 + $0x1e8] sm:$0xff]  ;;  %140 = vmatpush.msra.mxu0 %v100_v3  ;;  %v98_v6 = vld [vmem:[%s1630_s26 + $0xe0] sm:$0xff] }
   0xf   :  { %200 = vmatpush.msra.mxu3 %v133_v2  ;;  %v97_v5 = vld [vmem:[%s1630_s26 + $0xd8] sm:$0xff]  ;;  %v132_v7 = vld [vmem:[%s1630_s26 + $0x1f0] sm:$0xff]  ;;  %v130_v10 = vld [vmem:[%s1630_s26 + $0x1e0] sm:$0xff] }
  0x10   :  { %181 = vmatpush.msra.mxu2 %v99_v1  ;;  %v129_v8 = vld [vmem:[%s1630_s26 + $0x1d8] sm:$0xff]  ;;  %v96_v9 = vld [vmem:[%s1630_s26 + $0xd0] sm:$0xff]  ;;  %141 = vmatpush.msra.mxu0 %v98_v6  ;;  %v95_v11 = vld [vmem:[%s1630_s26 + $0xc8] sm:$0xff] }
  0x11   :  { %201 = vmatpush.msra.mxu3 %v131_v4  ;;  %160 = vmatpush.msra.mxu1 %v132_v7  ;;  %v127_v12 = vld [vmem:[%s1630_s26 + $0x1c8] sm:$0xff]  ;;  %v94_v13 = vld [vmem:[%s1630_s26 + $0xc0] sm:$0xff]  ;;  %v128_v14 = vld [vmem:[%s1630_s26 + $0x1d0] sm:$0xff] }
  0x12   :  { %182 = vmatpush.msra.mxu2 %v97_v5  ;;  %142 = vmatpush.msra.mxu0 %v96_v9  ;;  %v93_v15 = vld [vmem:[%s1630_s26 + $0xb8] sm:$0xff]  ;;  %v92_v17 = vld [vmem:[%s1630_s26 + $0xb0] sm:$0xff]  ;;  %v126_v18 = vld [vmem:[%s1630_s26 + $0x1c0] sm:$0xff] }
  0x13   :  { %202 = vmatpush.msra.mxu3 %v129_v8  ;;  %161 = vmatpush.msra.mxu1 %v130_v10  ;;  %v125_v16 = vld [vmem:[%s1630_s26 + $0x1b8] sm:$0xff]  ;;  %v91_v19 = vld [vmem:[%s1630_s26 + $0xa8] sm:$0xff]  ;;  %v90_v21 = vld [vmem:[%s1630_s26 + $0xa0] sm:$0xff] }
  0x14   :  { %183 = vmatpush.msra.mxu2 %v95_v11  ;;  %143 = vmatpush.msra.mxu0 %v94_v13  ;;  %v123_v20 = vld [vmem:[%s1630_s26 + $0x1a8] sm:$0xff]  ;;  %v124_v22 = vld [vmem:[%s1630_s26 + $0x1b0] sm:$0xff]  ;;  %v89_v23 = vld [vmem:[%s1630_s26 + $0x98] sm:$0xff] }
  0x15   :  { %203 = vmatpush.msra.mxu3 %v127_v12  ;;  %162 = vmatpush.msra.mxu1 %v128_v14  ;;  %v121_v24 = vld [vmem:[%s1630_s26 + $0x198] sm:$0xff]  ;;  %v88_v25 = vld [vmem:[%s1630_s26 + $0x90] sm:$0xff]  ;;  %v122_v26 = vld [vmem:[%s1630_s26 + $0x1a0] sm:$0xff] }
  0x16   :  { %184 = vmatpush.msra.mxu2 %v93_v15  ;;  %144 = vmatpush.msra.mxu0 %v92_v17  ;;  %v87_v27 = vld [vmem:[%s1630_s26 + $0x88] sm:$0xff]  ;;  %v86_v29 = vld [vmem:[%s1630_s26 + $0x80] sm:$0xff]  ;;  %v120_v30 = vld [vmem:[%s1630_s26 + $0x190] sm:$0xff] }
  0x17   :  { %204 = vmatpush.msra.mxu3 %v125_v16  ;;  %163 = vmatpush.msra.mxu1 %v126_v18  ;;  %v119_v28 = vld [vmem:[%s1630_s26 + $0x188] sm:$0xff]  ;;  %v85_v31 = vld [vmem:[%s1630_s26 + $0x78] sm:$0xff]  ;;  %v84_v33 = vld [vmem:[%s1630_s26 + $0x70] sm:$0xff] }
  0x18   :  { %185 = vmatpush.msra.mxu2 %v91_v19  ;;  %145 = vmatpush.msra.mxu0 %v90_v21  ;;  %v117_v32 = vld [vmem:[%s1630_s26 + $0x178] sm:$0xff]  ;;  %v118_v34 = vld [vmem:[%s1630_s26 + $0x180] sm:$0xff]  ;;  %v83_v35 = vld [vmem:[%s1630_s26 + $0x68] sm:$0xff] }
  0x19   :  { %205 = vmatpush.msra.mxu3 %v123_v20  ;;  %164 = vmatpush.msra.mxu1 %v124_v22  ;;  %v115_v36 = vld [vmem:[%s1630_s26 + $0x168] sm:$0xff]  ;;  %v82_v37 = vld [vmem:[%s1630_s26 + $0x60] sm:$0xff]  ;;  %v116_v38 = vld [vmem:[%s1630_s26 + $0x170] sm:$0xff] }
  0x1a   :  { %186 = vmatpush.msra.mxu2 %v89_v23  ;;  %146 = vmatpush.msra.mxu0 %v88_v25  ;;  %v81_v39 = vld [vmem:[%s1630_s26 + $0x58] sm:$0xff]  ;;  %v80_v41 = vld [vmem:[%s1630_s26 + $0x50] sm:$0xff]  ;;  %v114_v42 = vld [vmem:[%s1630_s26 + $0x160] sm:$0xff] }
  0x1b   :  { %206 = vmatpush.msra.mxu3 %v121_v24  ;;  %165 = vmatpush.msra.mxu1 %v122_v26  ;;  %v113_v40 = vld [vmem:[%s1630_s26 + $0x158] sm:$0xff]  ;;  %v79_v43 = vld [vmem:[%s1630_s26 + $0x48] sm:$0xff]  ;;  %v78_v45 = vld [vmem:[%s1630_s26 + $0x40] sm:$0xff] }
  0x1c   :  { %187 = vmatpush.msra.mxu2 %v87_v27  ;;  %147 = vmatpush.msra.mxu0 %v86_v29  ;;  %v111_v44 = vld [vmem:[%s1630_s26 + $0x148] sm:$0xff]  ;;  %v112_v46 = vld [vmem:[%s1630_s26 + $0x150] sm:$0xff]  ;;  %v77_v47 = vld [vmem:[%s1630_s26 + $0x38] sm:$0xff] }
  0x1d   :  { %207 = vmatpush.msra.mxu3 %v119_v28  ;;  %166 = vmatpush.msra.mxu1 %v120_v30  ;;  %v109_v48 = vld [vmem:[%s1630_s26 + $0x138] sm:$0xff]  ;;  %v76_v49 = vld [vmem:[%s1630_s26 + $0x30] sm:$0xff]  ;;  %v110_v50 = vld [vmem:[%s1630_s26 + $0x140] sm:$0xff] }
  0x1e   :  { %188 = vmatpush.msra.mxu2 %v85_v31  ;;  %148 = vmatpush.msra.mxu0 %v84_v33  ;;  %v75_v51 = vld [vmem:[%s1630_s26 + $0x28] sm:$0xff]  ;;  %v74_v53 = vld [vmem:[%s1630_s26 + $0x20] sm:$0xff]  ;;  %v108_v54 = vld [vmem:[%s1630_s26 + $0x130] sm:$0xff] }
  0x1f   :  { %208 = vmatpush.msra.mxu3 %v117_v32  ;;  %167 = vmatpush.msra.mxu1 %v118_v34  ;;  %v107_v52 = vld [vmem:[%s1630_s26 + $0x128] sm:$0xff]  ;;  %v73_v55 = vld [vmem:[%s1630_s26 + $0x18] sm:$0xff]  ;;  %v72_v57 = vld [vmem:[%s1630_s26 + $0x10] sm:$0xff] }
  0x20   :  { %189 = vmatpush.msra.mxu2 %v83_v35  ;;  %149 = vmatpush.msra.mxu0 %v82_v37  ;;  %v105_v56 = vld [vmem:[%s1630_s26 + $0x118] sm:$0xff]  ;;  %v106_v58 = vld [vmem:[%s1630_s26 + $0x120] sm:$0xff]  ;;  %v71_v59 = vld [vmem:[%s1630_s26 + $0x8] sm:$0xff] }
  0x21   :  { %209 = vmatpush.msra.mxu3 %v115_v36  ;;  %168 = vmatpush.msra.mxu1 %v116_v38  ;;  %v103_v60 = vld [vmem:[%s1630_s26 + $0x108] sm:$0xff]  ;;  %v68_v61 = vld [vmem:[%s1631_s0] sm:$0xff]  ;;  %v104_v0 = vld [vmem:[%s1630_s26 + $0x110] sm:$0xff] }
  0x22   :  { %190 = vmatpush.msra.mxu2 %v81_v39  ;;  %150 = vmatpush.msra.mxu0 %v80_v41  ;;  %v69_v62 = vld [vmem:[%s1631_s0 + $0x8] sm:$0xff]  ;;  %v70_v63 = vld [vmem:[%s1630_s26] sm:$0xff]  ;;  %v237_v2 = vld [vmem:[%s1632_s2 + $0x78] sm:$0xff] }
  0x23   :  { %210 = vmatpush.msra.mxu3 %v113_v40  ;;  %169 = vmatpush.msra.mxu1 %v114_v42  ;;  %v102_v1 = vld [vmem:[%s1630_s26 + $0x100] sm:$0xff]  ;;  %v236_v3 = vld [vmem:[%s1632_s2 + $0x70] sm:$0xff]  ;;  %v253_v4 = vld [vmem:[%s1632_s2 + $0xf8] sm:$0xff] }
  0x24   :  { %191 = vmatpush.msra.mxu2 %v79_v43  ;;  %151 = vmatpush.msra.mxu0 %v78_v45  ;;  %v235_v5 = vld [vmem:[%s1632_s2 + $0x68] sm:$0xff]  ;;  %v252_v6 = vld [vmem:[%s1632_s2 + $0xf0] sm:$0xff]  ;;  %v234_v7 = vld [vmem:[%s1632_s2 + $0x60] sm:$0xff] }
  0x25   :  { %211 = vmatpush.msra.mxu3 %v111_v44  ;;  %170 = vmatpush.msra.mxu1 %v112_v46  ;;  %v251_v8 = vld [vmem:[%s1632_s2 + $0xe8] sm:$0xff]  ;;  %v233_v9 = vld [vmem:[%s1632_s2 + $0x58] sm:$0xff]  ;;  %v250_v10 = vld [vmem:[%s1632_s2 + $0xe0] sm:$0xff] }
  0x26   :  { %192 = vmatpush.msra.mxu2 %v77_v47  ;;  %152 = vmatpush.msra.mxu0 %v76_v49  ;;  %v232_v11 = vld [vmem:[%s1632_s2 + $0x50] sm:$0xff]  ;;  %v249_v12 = vld [vmem:[%s1632_s2 + $0xd8] sm:$0xff]  ;;  %v231_v13 = vld [vmem:[%s1632_s2 + $0x48] sm:$0xff] }
  0x27   :  { %212 = vmatpush.msra.mxu3 %v109_v48  ;;  %171 = vmatpush.msra.mxu1 %v110_v50  ;;  %v248_v14 = vld [vmem:[%s1632_s2 + $0xd0] sm:$0xff]  ;;  %v230_v15 = vld [vmem:[%s1632_s2 + $0x40] sm:$0xff]  ;;  %v247_v16 = vld [vmem:[%s1632_s2 + $0xc8] sm:$0xff] }
  0x28   :  { %193 = vmatpush.msra.mxu2 %v75_v51  ;;  %153 = vmatpush.msra.mxu0 %v74_v53  ;;  %v229_v17 = vld [vmem:[%s1632_s2 + $0x38] sm:$0xff]  ;;  %v246_v18 = vld [vmem:[%s1632_s2 + $0xc0] sm:$0xff]  ;;  %v228_v19 = vld [vmem:[%s1632_s2 + $0x30] sm:$0xff] }
  0x29   :  { %213 = vmatpush.msra.mxu3 %v107_v52  ;;  %172 = vmatpush.msra.mxu1 %v108_v54  ;;  %v245_v20 = vld [vmem:[%s1632_s2 + $0xb8] sm:$0xff]  ;;  %v227_v21 = vld [vmem:[%s1632_s2 + $0x28] sm:$0xff]  ;;  %v244_v22 = vld [vmem:[%s1632_s2 + $0xb0] sm:$0xff] }
  0x2a   :  { %194 = vmatpush.msra.mxu2 %v73_v55  ;;  %154 = vmatpush.msra.mxu0 %v72_v57  ;;  %v226_v23 = vld [vmem:[%s1632_s2 + $0x20] sm:$0xff]  ;;  %v243_v24 = vld [vmem:[%s1632_s2 + $0xa8] sm:$0xff]  ;;  %v225_v25 = vld [vmem:[%s1632_s2 + $0x18] sm:$0xff] }
  0x2b   :  { %214 = vmatpush.msra.mxu3 %v105_v56  ;;  %173 = vmatpush.msra.mxu1 %v106_v58  ;;  %v242_v26 = vld [vmem:[%s1632_s2 + $0xa0] sm:$0xff]  ;;  %v224_v27 = vld [vmem:[%s1632_s2 + $0x10] sm:$0xff]  ;;  %v241_v28 = vld [vmem:[%s1632_s2 + $0x98] sm:$0xff] }
  0x2c   :  { %195 = vmatpush.msra.mxu2 %v71_v59  ;;  %155 = vmatpush.msra.mxu0 %v70_v63  ;;  %v223_v29 = vld [vmem:[%s1632_s2 + $0x8] sm:$0xff]  ;;  %v240_v30 = vld [vmem:[%s1632_s2 + $0x90] sm:$0xff]  ;;  %v222_v31 = vld [vmem:[%s1632_s2] sm:$0xff] }
  0x2d   :  { %215 = vmatpush.msra.mxu3 %v103_v60  ;;  %196 = vmatmul.f32.vlgmr.msra.gmra.mxu2 %v68_v61  ;;  %v239_v32 = vld [vmem:[%s1632_s2 + $0x88] sm:$0xff]  ;;  %v238_v33 = vld [vmem:[%s1632_s2 + $0x80] sm:$0xff]  ;;  %v314_v34 = vld [vmem:[%s1633_s4 + $0x78] sm:$0xff] }
  0x2e   :  { %216 = vmatmul.f32.vlgmr.msra.gmra.mxu3 %v69_v62  ;;  %174 = vmatpush.msra.mxu1 %v104_v0  ;;  %v313_v35 = vld [vmem:[%s1633_s4 + $0x70] sm:$0xff]  ;;  %v312_v36 = vld [vmem:[%s1633_s4 + $0x68] sm:$0xff]  ;;  %v311_v37 = vld [vmem:[%s1633_s4 + $0x60] sm:$0xff] }
  0x2f   :  { %156 = vmatmul.f32.vlgmr.msra.gmra.mxu0 %v68_v61  ;;  %319 = vmatpush.msrb.mxu2 %v314_v34  ;;  %v310_v38 = vld [vmem:[%s1633_s4 + $0x58] sm:$0xff]  ;;  %v309_v39 = vld [vmem:[%s1633_s4 + $0x50] sm:$0xff]  ;;  %v308_v40 = vld [vmem:[%s1633_s4 + $0x48] sm:$0xff] }
  0x30   :  { %175 = vmatpush.msra.mxu1 %v102_v1  ;;  %258 = vmatpush.msrb.mxu0 %v237_v2  ;;  %v307_v41 = vld [vmem:[%s1633_s4 + $0x40] sm:$0xff]  ;;  %v306_v42 = vld [vmem:[%s1633_s4 + $0x38] sm:$0xff]  ;;  %v305_v44 = vld [vmem:[%s1633_s4 + $0x30] sm:$0xff] }
  0x31   :  { %176 = vmatmul.f32.vlgmr.msra.gmra.mxu1 %v69_v62  ;;  %320 = vmatpush.msrb.mxu2 %v313_v35  ;;  %v134_v43 = vld [vmem:[%s1634_s30] sm:$0x3]  ;;  %v304_v46 = vld [vmem:[%s1633_s4 + $0x28] sm:$0xff]  ;;  %v302_v59 = vld [vmem:[%s1633_s4 + $0x18] sm:$0xff] }
  0x32   :  { %259 = vmatpush.msrb.mxu0 %v236_v3  ;;  %278 = vmatpush.msrb.mxu1 %v253_v4  ;;  %v136_v45 = vperm.slane %v134_v43, 0  ;;  %v303_v47 = vld [vmem:[%s1633_s4 + $0x20] sm:$0xff]  ;;  %v137_v50 = vperm.slane %v134_v43, 1  ;;  %v301_v60 = vld [vmem:[%s1633_s4 + $0x10] sm:$0xff]  ;;  %v300_v61 = vld [vmem:[%s1633_s4 + $0x8] sm:$0xff] }
  0x33   :  { %321 = vmatpush.msrb.mxu2 %v312_v36  ;;  %v299_v62 = vld [vmem:[%s1633_s4] sm:$0xff]  ;;  %v355_v63 = vld [vmem:[%s1605_s7 + $0x78] sm:$0xff]  ;;  %v354_v0 = vld [vmem:[%s1605_s7 + $0x70] sm:$0xff] }
  0x34   :  { %260 = vmatpush.msrb.mxu0 %v235_v5  ;;  %279 = vmatpush.msrb.mxu1 %v252_v6  ;;  %v353_v1 = vld [vmem:[%s1605_s7 + $0x68] sm:$0xff]  ;;  %v352_v2 = vld [vmem:[%s1605_s7 + $0x60] sm:$0xff]  ;;  %v351_v3 = vld [vmem:[%s1605_s7 + $0x58] sm:$0xff] }
  0x35   :  { %322 = vmatpush.msrb.mxu2 %v311_v37  ;;  %360 = vmatpush.msrb.mxu3 %v355_v63  ;;  %v350_v4 = vld [vmem:[%s1605_s7 + $0x50] sm:$0xff]  ;;  %v349_v5 = vld [vmem:[%s1605_s7 + $0x48] sm:$0xff]  ;;  %v348_v6 = vld [vmem:[%s1605_s7 + $0x40] sm:$0xff] }
  0x36   :  { %261 = vmatpush.msrb.mxu0 %v234_v7  ;;  %280 = vmatpush.msrb.mxu1 %v251_v8  ;;  %v347_v7 = vld [vmem:[%s1605_s7 + $0x38] sm:$0xff]  ;;  %v346_v8 = vld [vmem:[%s1605_s7 + $0x30] sm:$0xff]  ;;  %v711_v34 = vld [vmem:[%s1604_s6] ss:$0 sm:$0xff] }
  0x37   :  { %323 = vmatpush.msrb.mxu2 %v310_v38  ;;  %361 = vmatpush.msrb.mxu3 %v354_v0  ;;  %v383_v38 = vld [vmem:[%s1607_s9 + $0x10] sm:$0xff]  ;;  %v434_v43 = vld [vmem:[%s1609_s11 + $0x68] sm:$0xff]  ;;  %v474_v0 = vld [vmem:[%s1611_s13 + $0x60] sm:$0xff] }
  0x38   :  { %262 = vmatpush.msrb.mxu0 %v233_v9  ;;  %281 = vmatpush.msrb.mxu1 %v250_v10  ;;  %v345_v9 = vld [vmem:[%s1605_s7 + $0x28] sm:$0xff]  ;;  %v710_v10 = vld [vmem:[%s1635_s27] ss:$0 sm:$0xff] }
  0x39   :  { %324 = vmatpush.msrb.mxu2 %v309_v39  ;;  %362 = vmatpush.msrb.mxu3 %v353_v1  ;;  %v382_v39 = vld [vmem:[%s1607_s9 + $0x8] sm:$0xff]  ;;  %v473_v1 = vld [vmem:[%s1611_s13 + $0x58] sm:$0xff] }
  0x3a   :  { %263 = vmatpush.msrb.mxu0 %v232_v11  ;;  %282 = vmatpush.msrb.mxu1 %v249_v12  ;;  %v344_v11 = vld [vmem:[%s1605_s7 + $0x20] sm:$0xff]  ;;  %v343_v12 = vld [vmem:[%s1605_s7 + $0x18] sm:$0xff]  ;;  %v475_v63 = vld [vmem:[%s1611_s13 + $0x68] sm:$0xff] }
  0x3b   :  { %325 = vmatpush.msrb.mxu2 %v308_v40  ;;  %363 = vmatpush.msrb.mxu3 %v352_v2  ;;  %v381_v40 = vld [vmem:[%s1607_s9] sm:$0xff]  ;;  %v472_v2 = vld [vmem:[%s1611_s13 + $0x50] sm:$0xff] }
  0x3c   :  { %264 = vmatpush.msrb.mxu0 %v231_v13  ;;  %283 = vmatpush.msrb.mxu1 %v248_v14 }
  0x3d   :  { %326 = vmatpush.msrb.mxu2 %v307_v41  ;;  %364 = vmatpush.msrb.mxu3 %v351_v3  ;;  %v436_v41 = vld [vmem:[%s1609_s11 + $0x78] sm:$0xff]  ;;  %v471_v3 = vld [vmem:[%s1611_s13 + $0x48] sm:$0xff] }
  0x3e   :  { %265 = vmatpush.msrb.mxu0 %v230_v15  ;;  %284 = vmatpush.msrb.mxu1 %v247_v16 }
  0x3f   :  { %327 = vmatpush.msrb.mxu2 %v306_v42  ;;  %365 = vmatpush.msrb.mxu3 %v350_v4  ;;  %v435_v42 = vld [vmem:[%s1609_s11 + $0x70] sm:$0xff]  ;;  %v470_v4 = vld [vmem:[%s1611_s13 + $0x40] sm:$0xff] }
  0x40   :  { %266 = vmatpush.msrb.mxu0 %v229_v17  ;;  %285 = vmatpush.msrb.mxu1 %v246_v18  ;;  %v342_v18 = vld [vmem:[%s1605_s7 + $0x10] sm:$0xff] }
  0x41   :  { %328 = vmatpush.msrb.mxu2 %v305_v44  ;;  %366 = vmatpush.msrb.mxu3 %v349_v5  ;;  %v433_v44 = vld [vmem:[%s1609_s11 + $0x60] sm:$0xff]  ;;  %v469_v5 = vld [vmem:[%s1611_s13 + $0x38] sm:$0xff] }
  0x42   :  { %267 = vmatpush.msrb.mxu0 %v228_v19  ;;  %286 = vmatpush.msrb.mxu1 %v245_v20  ;;  %v341_v19 = vld [vmem:[%s1605_s7 + $0x8] sm:$0xff]  ;;  %v340_v20 = vld [vmem:[%s1605_s7] sm:$0xff] }
  0x43   :  { %329 = vmatpush.msrb.mxu2 %v304_v46  ;;  %367 = vmatpush.msrb.mxu3 %v348_v6  ;;  %v431_v46 = vld [vmem:[%s1609_s11 + $0x50] sm:$0xff] }
  0x44   :  { %268 = vmatpush.msrb.mxu0 %v227_v21  ;;  %287 = vmatpush.msrb.mxu1 %v244_v22  ;;  %v396_v21 = vld [vmem:[%s1607_s9 + $0x78] sm:$0xff]  ;;  %v395_v22 = vld [vmem:[%s1607_s9 + $0x70] sm:$0xff] }
  0x45   :  { %330 = vmatpush.msrb.mxu2 %v303_v47  ;;  %368 = vmatpush.msrb.mxu3 %v347_v7  ;;  %v430_v47 = vld [vmem:[%s1609_s11 + $0x48] sm:$0xff]  ;;  %v468_v6 = vld [vmem:[%s1611_s13 + $0x30] sm:$0xff] }
  0x46   :  { %269 = vmatpush.msrb.mxu0 %v226_v23  ;;  %288 = vmatpush.msrb.mxu1 %v243_v24  ;;  %v394_v23 = vld [vmem:[%s1607_s9 + $0x68] sm:$0xff]  ;;  %v393_v24 = vld [vmem:[%s1607_s9 + $0x60] sm:$0xff] }
  0x47   :  { %331 = vmatpush.msrb.mxu2 %v302_v59  ;;  %369 = vmatpush.msrb.mxu3 %v346_v8  ;;  %v422_v59 = vld [vmem:[%s1609_s11 + $0x8] sm:$0xff]  ;;  %v466_v8 = vld [vmem:[%s1611_s13 + $0x20] sm:$0xff] }
  0x48   :  { %270 = vmatpush.msrb.mxu0 %v225_v25  ;;  %289 = vmatpush.msrb.mxu1 %v242_v26  ;;  %v392_v25 = vld [vmem:[%s1607_s9 + $0x58] sm:$0xff]  ;;  %v391_v26 = vld [vmem:[%s1607_s9 + $0x50] sm:$0xff]  ;;  %v467_v7 = vld [vmem:[%s1611_s13 + $0x28] sm:$0xff] }
  0x49   :  { %332 = vmatpush.msrb.mxu2 %v301_v60  ;;  %370 = vmatpush.msrb.mxu3 %v345_v9  ;;  %v421_v60 = vld [vmem:[%s1609_s11] sm:$0xff]  ;;  %v465_v9 = vld [vmem:[%s1611_s13 + $0x18] sm:$0xff] }
  0x4a   :  { %271 = vmatpush.msrb.mxu0 %v224_v27  ;;  %290 = vmatpush.msrb.mxu1 %v241_v28  ;;  %v390_v27 = vld [vmem:[%s1607_s9 + $0x48] sm:$0xff]  ;;  %v389_v28 = vld [vmem:[%s1607_s9 + $0x40] sm:$0xff] }
  0x4b   :  { %333 = vmatpush.msrb.mxu2 %v300_v61  ;;  %371 = vmatpush.msrb.mxu3 %v344_v11  ;;  %v477_v61 = vld [vmem:[%s1611_s13 + $0x78] sm:$0xff] }
  0x4c   :  { %272 = vmatpush.msrb.mxu0 %v223_v29  ;;  %291 = vmatpush.msrb.mxu1 %v240_v30  ;;  %v388_v29 = vld [vmem:[%s1607_s9 + $0x38] sm:$0xff]  ;;  %v387_v30 = vld [vmem:[%s1607_s9 + $0x30] sm:$0xff] }
  0x4d   :  { %334 = vmatpush.msrb.mxu2 %v299_v62  ;;  %372 = vmatpush.msrb.mxu3 %v343_v12  ;;  %v476_v62 = vld [vmem:[%s1611_s13 + $0x70] sm:$0xff] }
  0x4e   :  { %273 = vmatpush.msrb.mxu0 %v222_v31  ;;  %292 = vmatpush.msrb.mxu1 %v239_v32  ;;  %v386_v31 = vld [vmem:[%s1607_s9 + $0x28] sm:$0xff]  ;;  %v385_v32 = vld [vmem:[%s1607_s9 + $0x20] sm:$0xff] }
  0x4f   :  { %373 = vmatpush.msrb.mxu3 %v342_v18  ;;  %483 = vmatpush.msra.mxu2 %v477_v61  ;;  %v517_v18 = vld [vmem:[%s1613_s15 + $0x70] sm:$0xff] }
  0x50   :  { %293 = vmatpush.msrb.mxu1 %v238_v33  ;;  %401 = vmatpush.msra.mxu0 %v396_v21  ;;  %v384_v33 = vld [vmem:[%s1607_s9 + $0x18] sm:$0xff]  ;;  %v611_v61 = vld [vmem:[%s1617_s19 + $0xd0] sm:$0xff] }
  0x51   :  { %374 = vmatpush.msrb.mxu3 %v341_v19  ;;  %484 = vmatpush.msra.mxu2 %v476_v62  ;;  %v516_v19 = vld [vmem:[%s1613_s15 + $0x68] sm:$0xff]  ;;  %v514_v21 = vld [vmem:[%s1613_s15 + $0x58] sm:$0xff] }
  0x52   :  { %402 = vmatpush.msra.mxu0 %v395_v22  ;;  %442 = vmatpush.msra.mxu1 %v436_v41  ;;  %v513_v22 = vld [vmem:[%s1613_s15 + $0x50] sm:$0xff]  ;;  %v555_v41 = vld [vmem:[%s1615_s17 + $0x58] sm:$0xff] }
  0x53   :  { %375 = vmatpush.msrb.mxu3 %v340_v20  ;;  %485 = vmatpush.msra.mxu2 %v475_v63  ;;  %v515_v20 = vld [vmem:[%s1613_s15 + $0x60] sm:$0xff]  ;;  %v612_v62 = vld [vmem:[%s1617_s19 + $0xd8] sm:$0xff] }
  0x54   :  { %403 = vmatpush.msra.mxu0 %v394_v23  ;;  %443 = vmatpush.msra.mxu1 %v435_v42  ;;  %v512_v23 = vld [vmem:[%s1613_s15 + $0x48] sm:$0xff]  ;;  %v554_v42 = vld [vmem:[%s1615_s17 + $0x50] sm:$0xff]  ;;  %v609_v63 = vld [vmem:[%s1617_s19 + $0xc0] sm:$0xff] }
  0x55   :  { %486 = vmatpush.msra.mxu2 %v474_v0  ;;  %v610_v0 = vld [vmem:[%s1617_s19 + $0xc8] sm:$0xff] }
  0x56   :  { %404 = vmatpush.msra.mxu0 %v393_v24  ;;  %444 = vmatpush.msra.mxu1 %v434_v43  ;;  %v511_v24 = vld [vmem:[%s1613_s15 + $0x40] sm:$0xff]  ;;  %v553_v43 = vld [vmem:[%s1615_s17 + $0x48] sm:$0xff] }
  0x57   :  { %487 = vmatpush.msra.mxu2 %v473_v1  ;;  %v607_v1 = vld [vmem:[%s1617_s19 + $0xb0] sm:$0xff] }
  0x58   :  { %405 = vmatpush.msra.mxu0 %v392_v25  ;;  %445 = vmatpush.msra.mxu1 %v433_v44  ;;  %v510_v25 = vld [vmem:[%s1613_s15 + $0x38] sm:$0xff]  ;;  %v552_v44 = vld [vmem:[%s1615_s17 + $0x40] sm:$0xff] }
  0x59   :  { %488 = vmatpush.msra.mxu2 %v472_v2  ;;  %v608_v2 = vld [vmem:[%s1617_s19 + $0xb8] sm:$0xff] }
  0x5a   :  { %406 = vmatpush.msra.mxu0 %v391_v26  ;;  %v509_v26 = vld [vmem:[%s1613_s15 + $0x30] sm:$0xff] }
  0x5b   :  { %489 = vmatpush.msra.mxu2 %v471_v3  ;;  %v605_v3 = vld [vmem:[%s1617_s19 + $0xa0] sm:$0xff] }
  0x5c   :  { %407 = vmatpush.msra.mxu0 %v390_v27  ;;  %v508_v27 = vld [vmem:[%s1613_s15 + $0x28] sm:$0xff] }
  0x5d   :  { %490 = vmatpush.msra.mxu2 %v470_v4  ;;  %v606_v4 = vld [vmem:[%s1617_s19 + $0xa8] sm:$0xff] }
  0x5e   :  { %408 = vmatpush.msra.mxu0 %v389_v28  ;;  %v507_v28 = vld [vmem:[%s1613_s15 + $0x20] sm:$0xff] }
  0x5f   :  { %491 = vmatpush.msra.mxu2 %v469_v5  ;;  %v603_v5 = vld [vmem:[%s1617_s19 + $0x90] sm:$0xff] }
  0x60   :  { %409 = vmatpush.msra.mxu0 %v388_v29  ;;  %v506_v29 = vld [vmem:[%s1613_s15 + $0x18] sm:$0xff] }
  0x61   :  { %492 = vmatpush.msra.mxu2 %v468_v6  ;;  %v604_v6 = vld [vmem:[%s1617_s19 + $0x98] sm:$0xff] }
  0x62   :  { %410 = vmatpush.msra.mxu0 %v387_v30  ;;  %v714_v30 = vld [vmem:[%s1610_s12] ss:$0 sm:$0xff] }
  0x63   :  { %493 = vmatpush.msra.mxu2 %v467_v7  ;;  %v601_v7 = vld [vmem:[%s1617_s19 + $0x80] sm:$0xff] }
  0x64   :  { %411 = vmatpush.msra.mxu0 %v386_v31 }
  0x65   :  { %494 = vmatpush.msra.mxu2 %v466_v8  ;;  %v602_v8 = vld [vmem:[%s1617_s19 + $0x88] sm:$0xff] }
  0x66   :  { %412 = vmatpush.msra.mxu0 %v385_v32 }
  0x67   :  { %495 = vmatpush.msra.mxu2 %v465_v9  ;;  %v599_v9 = vld [vmem:[%s1617_s19 + $0x70] sm:$0xff] }
  0x68   :  { %413 = vmatpush.msra.mxu0 %v384_v33 }
  0x6a   :  { %414 = vmatpush.msra.mxu0 %v383_v38  ;;  %v558_v38 = vld [vmem:[%s1615_s17 + $0x70] sm:$0xff] }
  0x6c   :  { %415 = vmatpush.msra.mxu0 %v382_v39  ;;  %v557_v39 = vld [vmem:[%s1615_s17 + $0x68] sm:$0xff] }
  0x6e   :  { %416 = vmatpush.msra.mxu0 %v381_v40  ;;  %v556_v40 = vld [vmem:[%s1615_s17 + $0x60] sm:$0xff] }
  0xac   :  { %v157_v48 = vpop.f32.mrf.mxu0 }
  0xad   :  { %v158_v49 = vadd.f32 %v157_v48, %v136_v45  ;;  %v432_v45 = vld [vmem:[%s1609_s11 + $0x58] sm:$0xff]  ;;  %v429_v48 = vld [vmem:[%s1609_s11 + $0x40] sm:$0xff] }
  0xae   :  { %v177_v51 = vpop.f32.mrf.mxu1  ;;  %446 = vmatpush.msra.mxu1 %v432_v45  ;;  %v551_v45 = vld [vmem:[%s1615_s17 + $0x38] sm:$0xff] }
  0xaf   :  { %v178_v52 = vadd.f32 %v177_v51, %v158_v49  ;;  %v428_v49 = vld [vmem:[%s1609_s11 + $0x38] sm:$0xff]  ;;  %v426_v51 = vld [vmem:[%s1609_s11 + $0x28] sm:$0xff] }
  0xb0   :  { %v197_v53 = vpop.f32.mrf.mxu2  ;;  %447 = vmatpush.msra.mxu1 %v431_v46  ;;  %v550_v46 = vld [vmem:[%s1615_s17 + $0x30] sm:$0xff] }
  0xb1   :  { %v217_v54 = vpop.f32.mrf.mxu3  ;;  %v220_v55 = vmax.f32 %v178_v52, 0.0  ;;  %v198_v56 = vadd.f32 %v197_v53, %v137_v50  ;;  %v427_v50 = vld [vmem:[%s1609_s11 + $0x30] sm:$0xff]  ;;  %v425_v52 = vld [vmem:[%s1609_s11 + $0x20] sm:$0xff]  ;;  %v424_v53 = vld [vmem:[%s1609_s11 + $0x18] sm:$0xff] }
  0xb2   :  { %448 = vmatpush.msra.mxu1 %v430_v47  ;;  %v549_v47 = vld [vmem:[%s1615_s17 + $0x28] sm:$0xff] }
  0xb3   :  { %v218_v57 = vadd.f32 %v217_v54, %v198_v56  ;;  %274 = vmatmul.f32.vlgmr.msrb.gmra.mxu0 %v220_v55  ;;  %v712_v54 = vld [vmem:[%s1606_s8] ss:$0 sm:$0xff] }
  0xb4   :  { %449 = vmatpush.msra.mxu1 %v429_v48  ;;  %v548_v48 = vld [vmem:[%s1615_s17 + $0x20] sm:$0xff] }
  0xb5   :  { %v221_v58 = vmax.f32 %v218_v57, 0.0 }
  0xb6   :  { %450 = vmatpush.msra.mxu1 %v428_v49  ;;  %v547_v49 = vld [vmem:[%s1615_s17 + $0x18] sm:$0xff] }
  0xb7   :  { %294 = vmatmul.f32.vlgmr.msrb.gmra.mxu1 %v221_v58  ;;  %v423_v58 = vld [vmem:[%s1609_s11 + $0x10] sm:$0xff] }
  0xb8   :  { %451 = vmatpush.msra.mxu1 %v427_v50  ;;  %v715_v50 = vld [vmem:[%s1612_s14] ss:$0 sm:$0xff] }
  0xba   :  { %452 = vmatpush.msra.mxu1 %v426_v51 }
  0xbc   :  { %453 = vmatpush.msra.mxu1 %v425_v52 }
  0xbe   :  { %454 = vmatpush.msra.mxu1 %v424_v53 }
  0xc0   :  { %455 = vmatpush.msra.mxu1 %v423_v58  ;;  %v616_v58 = vld [vmem:[%s1617_s19 + $0xf8] sm:$0xff] }
  0xc2   :  { %456 = vmatpush.msra.mxu1 %v422_v59  ;;  %v613_v59 = vld [vmem:[%s1617_s19 + $0xe0] sm:$0xff] }
  0xc4   :  { %457 = vmatpush.msra.mxu1 %v421_v60  ;;  %v614_v60 = vld [vmem:[%s1617_s19 + $0xe8] sm:$0xff] }
 0x130   :  { %v275_v13 = vpop.f32.mrf.mxu0 }
 0x131   :  { %v276_v14 = vadd.f32 %v710_v10, %v275_v13  ;;  %v713_v10 = vld [vmem:[%s1608_s10] ss:$0 sm:$0xff] }
 0x134   :  { %v295_v15 = vpop.f32.mrf.mxu1 }
 0x135   :  { %v296_v16 = vadd.f32 %v295_v15, %v276_v14  ;;  %v464_v14 = vld [vmem:[%s1611_s13 + $0x10] sm:$0xff]  ;;  %v463_v15 = vld [vmem:[%s1611_s13 + $0x8] sm:$0xff] }
 0x136   :  { %496 = vmatpush.msra.mxu2 %v464_v14  ;;  %v596_v14 = vld [vmem:[%s1617_s19 + $0x58] sm:$0xff] }
 0x137   :  { %v298_v17 = vmax.f32 %v296_v16, 0.0  ;;  %v462_v16 = vld [vmem:[%s1611_s13] sm:$0xff] }
 0x138   :  { %497 = vmatpush.msra.mxu2 %v463_v15  ;;  %v593_v15 = vld [vmem:[%s1617_s19 + $0x40] sm:$0xff] }
 0x139   :  { %335 = vmatmul.f32.vlgmr.msrb.gmra.mxu2 %v298_v17  ;;  %v518_v17 = vld [vmem:[%s1613_s15 + $0x78] sm:$0xff] }
 0x13a   :  { %498 = vmatpush.msra.mxu2 %v462_v16  ;;  %524 = vmatpush.msra.mxu3 %v518_v17  ;;  %v594_v16 = vld [vmem:[%s1617_s19 + $0x48] sm:$0xff]  ;;  %v591_v17 = vld [vmem:[%s1617_s19 + $0x30] sm:$0xff] }
 0x13c   :  { %525 = vmatpush.msra.mxu3 %v517_v18  ;;  %644 = vmatpush.msrb.mxu2 %v616_v58  ;;  %v592_v18 = vld [vmem:[%s1617_s19 + $0x38] sm:$0xff] }
 0x13e   :  { %526 = vmatpush.msra.mxu3 %v516_v19  ;;  %645 = vmatpush.msrb.mxu2 %v614_v60  ;;  %v716_v19 = vld [vmem:[%s1614_s16] ss:$0 sm:$0xff] }
 0x140   :  { %527 = vmatpush.msra.mxu3 %v515_v20  ;;  %646 = vmatpush.msrb.mxu2 %v612_v62 }
 0x142   :  { %528 = vmatpush.msra.mxu3 %v514_v21  ;;  %647 = vmatpush.msrb.mxu2 %v610_v0 }
 0x144   :  { %529 = vmatpush.msra.mxu3 %v513_v22  ;;  %648 = vmatpush.msrb.mxu2 %v608_v2 }
 0x146   :  { %530 = vmatpush.msra.mxu3 %v512_v23  ;;  %649 = vmatpush.msrb.mxu2 %v606_v4  ;;  %v589_v23 = vld [vmem:[%s1617_s19 + $0x20] sm:$0xff] }
 0x148   :  { %531 = vmatpush.msra.mxu3 %v511_v24  ;;  %650 = vmatpush.msrb.mxu2 %v604_v6  ;;  %v590_v24 = vld [vmem:[%s1617_s19 + $0x28] sm:$0xff] }
 0x14a   :  { %532 = vmatpush.msra.mxu3 %v510_v25  ;;  %651 = vmatpush.msrb.mxu2 %v602_v8  ;;  %v587_v25 = vld [vmem:[%s1617_s19 + $0x10] sm:$0xff] }
 0x14c   :  { %533 = vmatpush.msra.mxu3 %v509_v26  ;;  %v588_v26 = vld [vmem:[%s1617_s19 + $0x18] sm:$0xff] }
 0x14e   :  { %534 = vmatpush.msra.mxu3 %v508_v27  ;;  %v585_v27 = vld [vmem:[%s1617_s19] sm:$0xff] }
 0x150   :  { %535 = vmatpush.msra.mxu3 %v507_v28  ;;  %v586_v28 = vld [vmem:[%s1617_s19 + $0x8] sm:$0xff] }
 0x152   :  { %536 = vmatpush.msra.mxu3 %v506_v29  ;;  %v717_v29 = vld [vmem:[%s1616_s18] ss:$0 sm:$0xff] }
 0x1bc   :  { %v336_v35 = vpop.f32.mrf.mxu2 }
 0x1bd   :  { %v337_v36 = vadd.f32 %v711_v34, %v336_v35  ;;  %v505_v34 = vld [vmem:[%s1613_s15 + $0x10] sm:$0xff]  ;;  %v504_v35 = vld [vmem:[%s1613_s15 + $0x8] sm:$0xff] }
 0x1be   :  { %537 = vmatpush.msra.mxu3 %v505_v34 }
 0x1bf   :  { %v339_v37 = vmax.f32 %v337_v36, 0.0  ;;  %v503_v36 = vld [vmem:[%s1613_s15] sm:$0xff] }
 0x1c0   :  { %538 = vmatpush.msra.mxu3 %v504_v35 }
 0x1c1   :  { %376 = vmatmul.f32.vlgmr.msrb.gmra.mxu3 %v339_v37  ;;  %v559_v37 = vld [vmem:[%s1615_s17 + $0x78] sm:$0xff] }
 0x1c2   :  { %539 = vmatpush.msra.mxu3 %v503_v36  ;;  %565 = vmatpush.msrb.mxu0 %v559_v37 }
 0x1c4   :  { %566 = vmatpush.msrb.mxu0 %v558_v38 }
 0x1c6   :  { %567 = vmatpush.msrb.mxu0 %v557_v39 }
 0x1c8   :  { %568 = vmatpush.msrb.mxu0 %v556_v40 }
 0x1ca   :  { %569 = vmatpush.msrb.mxu0 %v555_v41 }
 0x1cc   :  { %570 = vmatpush.msrb.mxu0 %v554_v42 }
 0x1ce   :  { %571 = vmatpush.msrb.mxu0 %v553_v43 }
 0x1d0   :  { %572 = vmatpush.msrb.mxu0 %v552_v44 }
 0x1d2   :  { %573 = vmatpush.msrb.mxu0 %v551_v45 }
 0x1d4   :  { %574 = vmatpush.msrb.mxu0 %v550_v46 }
 0x1d6   :  { %575 = vmatpush.msrb.mxu0 %v549_v47 }
 0x1d8   :  { %576 = vmatpush.msrb.mxu0 %v548_v48 }
 0x1da   :  { %577 = vmatpush.msrb.mxu0 %v547_v49 }
 0x244   :  { %v377_v55 = vpop.f32.mrf.mxu3 }
 0x245   :  { %v378_v56 = vadd.f32 %v712_v54, %v377_v55  ;;  %v546_v54 = vld [vmem:[%s1615_s17 + $0x10] sm:$0xff]  ;;  %v545_v55 = vld [vmem:[%s1615_s17 + $0x8] sm:$0xff] }
 0x246   :  { %578 = vmatpush.msrb.mxu0 %v546_v54 }
 0x247   :  { %v380_v57 = vmax.f32 %v378_v56, 0.0  ;;  %v544_v56 = vld [vmem:[%s1615_s17] sm:$0xff] }
 0x248   :  { %579 = vmatpush.msrb.mxu0 %v545_v55 }
 0x249   :  { %417 = vmatmul.f32.vlgmr.msra.gmra.mxu0 %v380_v57  ;;  %v615_v57 = vld [vmem:[%s1617_s19 + $0xf0] sm:$0xff] }
 0x24a   :  { %580 = vmatpush.msrb.mxu0 %v544_v56  ;;  %624 = vmatpush.msrb.mxu1 %v615_v57 }
 0x24c   :  { %625 = vmatpush.msrb.mxu1 %v613_v59 }
 0x24e   :  { %626 = vmatpush.msrb.mxu1 %v611_v61 }
 0x250   :  { %627 = vmatpush.msrb.mxu1 %v609_v63 }
 0x252   :  { %628 = vmatpush.msrb.mxu1 %v607_v1 }
 0x254   :  { %629 = vmatpush.msrb.mxu1 %v605_v3 }
 0x256   :  { %630 = vmatpush.msrb.mxu1 %v603_v5 }
 0x258   :  { %631 = vmatpush.msrb.mxu1 %v601_v7 }
 0x25a   :  { %632 = vmatpush.msrb.mxu1 %v599_v9 }
 0x2c6   :  { %v418_v11 = vpop.f32.mrf.mxu0 }
 0x2c7   :  { %v419_v12 = vadd.f32 %v713_v10, %v418_v11  ;;  %v600_v10 = vld [vmem:[%s1617_s19 + $0x78] sm:$0xff]  ;;  %v597_v11 = vld [vmem:[%s1617_s19 + $0x60] sm:$0xff] }
 0x2c8   :  { %652 = vmatpush.msrb.mxu2 %v600_v10  ;;  %633 = vmatpush.msrb.mxu1 %v597_v11 }
 0x2c9   :  { %v438_v13 = vmax.f32 %v419_v12, 0.0  ;;  %v598_v12 = vld [vmem:[%s1617_s19 + $0x68] sm:$0xff] }
 0x2ca   :  { %653 = vmatpush.msrb.mxu2 %v598_v12 }
 0x2cb   :  { %458 = vmatmul.f32.vlgmr.msra.gmra.mxu1 %v438_v13  ;;  %v595_v13 = vld [vmem:[%s1617_s19 + $0x50] sm:$0xff] }
 0x2cc   :  { %634 = vmatpush.msrb.mxu1 %v595_v13  ;;  %654 = vmatpush.msrb.mxu2 %v596_v14 }
 0x2ce   :  { %635 = vmatpush.msrb.mxu1 %v593_v15  ;;  %655 = vmatpush.msrb.mxu2 %v594_v16 }
 0x2d0   :  { %636 = vmatpush.msrb.mxu1 %v591_v17  ;;  %656 = vmatpush.msrb.mxu2 %v592_v18 }
 0x2d2   :  { %637 = vmatpush.msrb.mxu1 %v589_v23  ;;  %657 = vmatpush.msrb.mxu2 %v590_v24 }
 0x2d4   :  { %638 = vmatpush.msrb.mxu1 %v587_v25  ;;  %658 = vmatpush.msrb.mxu2 %v588_v26 }
 0x2d6   :  { %639 = vmatpush.msrb.mxu1 %v585_v27  ;;  %659 = vmatpush.msrb.mxu2 %v586_v28 }
 0x348   :  { %v459_v31 = vpop.f32.mrf.mxu1 }
 0x349   :  { %v460_v32 = vadd.f32 %v714_v30, %v459_v31 }
 0x34b   :  { %v479_v33 = vmax.f32 %v460_v32, 0.0 }
 0x34d   :  { %499 = vmatmul.f32.vlgmr.msra.gmra.mxu2 %v479_v33  ;;  %v617_v33 = vld [vmem:[%s1618_s20] sm:$0x3] }
 0x34e   :  { %v620_v34 = vperm.slane %v617_v33, 0  ;;  %v621_v38 = vperm.slane %v617_v33, 1 }
 0x3d0   :  { %v500_v51 = vpop.f32.mrf.mxu2 }
 0x3d1   :  { %v501_v52 = vadd.f32 %v715_v50, %v500_v51 }
 0x3d3   :  { %v520_v53 = vmax.f32 %v501_v52, 0.0 }
 0x3d5   :  { %540 = vmatmul.f32.vlgmr.msra.gmra.mxu3 %v520_v53 }
 0x458   :  { %v541_v20 = vpop.f32.mrf.mxu3 }
 0x459   :  { %v542_v21 = vadd.f32 %v716_v19, %v541_v20 }
 0x45b   :  { %v561_v22 = vmax.f32 %v542_v21, 0.0 }
 0x45d   :  { %581 = vmatmul.f32.vlgmr.msrb.gmra.mxu0 %v561_v22 }
 0x4da   :  { %v582_v30 = vpop.f32.mrf.mxu0 }
 0x4db   :  { %v583_v31 = vadd.f32 %v717_v29, %v582_v30 }
 0x4dd   :  { %v618_v32 = vmax.f32 %v583_v31, 0.0 }
 0x4df   :  { %640 = vmatmul.f32.vlgmr.msrb.gmra.mxu1 %v618_v32  ;;  %660 = vmatmul.f32.vlgmr.msrb.gmra.mxu2 %v618_v32 }
 0x55c   :  { %v641_v35 = vpop.f32.mrf.mxu1 }
 0x55d   :  { %v642_v36 = vadd.f32 %v641_v35, %v620_v34 }
 0x55f   :  { %v708_v37 = vmul.f32 -1.442695, %v642_v36 }
 0x561   :  { %718 = vpow2.f32 %v708_v37 }
 0x562   :  { %v661_v39 = vpop.f32.mrf.mxu2 }
 0x563   :  { %v662_v40 = vadd.f32 %v661_v39, %v621_v38 }
 0x565   :  { %v709_v41 = vmul.f32 -1.442695, %v662_v40 }
 0x567   :  { %v719_v42 = vpop.eup %718  ;;  %720 = vpow2.f32 %v709_v41 }
 0x568   :  { %v670_v43 = vadd.f32 1.0, %v719_v42 }
 0x56a   :  { %722 = vrcp.f32 %v670_v43  ;;  %v683_v49 = vand.u32 2147483648, %v670_v43  ;;  %v681_v51 = vand.u32 2147483647, %v670_v43  ;;  %vm677_vm1 = vweird.f32 %v670_v43 }
 0x56c   :  { %v684_v55 = vor.u32 1.1754944e-38, %v683_v49  ;;  %vm682_vm3 = vcmp.eq.f32.partialorder %v681_v51, 8.507059e+37 }
 0x56d   :  { %v721_v44 = vpop.eup %720 }
 0x56e   :  { %v671_v45 = vadd.f32 1.0, %v721_v44 }
 0x570   :  { %v723_v46 = vpop.eup %722  ;;  %724 = vrcp.f32 %v671_v45  ;;  %v698_v59 = vand.u32 2147483648, %v671_v45  ;;  %v696_v61 = vand.u32 2147483647, %v671_v45  ;;  %vm692_vm5 = vweird.f32 %v671_v45 }
 0x571   :  { %v673_v47 = vmul.f32 %v723_v46, %v670_v43  ;;  %vm678_vm0 = vweird.f32 %v723_v46 }
 0x572   :  { %vm679_vm2 = vmor %vm677_vm1, %vm678_vm0  ;;  %v699_v63 = vor.u32 1.1754944e-38, %v698_v59  ;;  %vm697_vm7 = vcmp.eq.f32.partialorder %v696_v61, 8.507059e+37 }
 0x573   :  { %v674_v48 = vsub.f32 1.0, %v673_v47 }
 0x575   :  { %v675_v50 = vmul.f32 %v723_v46, %v674_v48 }
 0x576   :  { %v725_v52 = vpop.eup %724 }
 0x577   :  { %v676_v53 = vadd.f32 %v723_v46, %v675_v50  ;;  %v688_v54 = vmul.f32 %v725_v52, %v671_v45  ;;  %vm693_vm4 = vweird.f32 %v725_v52 }
 0x578   :  { %vm694_vm6 = vmor %vm692_vm5, %vm693_vm4 }
 0x579   :  { %v680_v56 = vsel %vm679_vm2, %v723_v46, %v676_v53  ;;  %v689_v57 = vsub.f32 1.0, %v688_v54 }
 0x57a   :  { %v685_v58 = vsel %vm682_vm3, %v684_v55, %v680_v56 }
 0x57b   :  { %702 = vst [vmem:[%s1619_s21] sm:$0xff] %v685_v58  ;;  %v690_v60 = vmul.f32 %v725_v52, %v689_v57 }
 0x57d   :  { %v691_v62 = vadd.f32 %v725_v52, %v690_v60 }
 0x57f   :  { %v695_v0 = vsel %vm694_vm6, %v725_v52, %v691_v62 }
 0x580   :  { %v700_v1 = vsel %vm697_vm7, %v699_v63, %v695_v0 }
 0x581   :  { %703 = vst [vmem:[%s1619_s21 + $0x8] sm:$0xff] %v700_v1 }

</bundles_post_ra>
